<compile_context>
chip_gen: v7x
topology: tpu7x:2x2x1
jax: 0.10.0
libtpu: 0.0.40
codegen_flags: <defaults>
</compile_context>

<pallas_src>
import functools

import jax
import jax.numpy as jnp
import numpy as np
from jax.experimental import pallas as pl
from jax.experimental.pallas import tpu as pltpu

_C = float(0.5 ** 0.5)


def _round_up(n, m):
    return ((n + m - 1) // m) * m


def _vmem_capacity_bytes():
    try:
        cap = getattr(pltpu.get_tpu_info(), "vmem_capacity_bytes", None)
        if cap:
            return int(cap)
    except Exception:
        pass
    return 64 << 20  # conservative (v7x per-TensorCore)


# ----------------------------- kernel ---------------------------------------
def sinres_kernel(x_ref, w_ref, b_ref, o_ref, *, has_process, split, compute_dtype):
    x = x_ref[...]
    xc = x.astype(compute_dtype)

    # Single fused matmul over the x tile; f32 accumulation, f32 bias add.
    z = jnp.dot(xc, w_ref[...], preferred_element_type=jnp.float32) + b_ref[...]

    if has_process:
        # columns [0:split)      = alpha*x @ W + b      (sine branch)
        # columns [split:2*split) = x @ Wp + bp          (residual branch)
        # `split` is a multiple of 128, so the slice is lane-aligned.
        y_new = jnp.sin(z[:, :split])
        y_old = z[:, split:]
    else:
        # process_x is Identity (out_dim == in_dim); keep the residual in f32.
        y_new = jnp.sin(z)
        y_old = x.astype(jnp.float32)
    # NOTE: a bf16 sine path (cast z to bf16 before sin on v6e/v7x) is a known
    # follow-up if bundle dumps show the VALU slot saturating; left out here.

    o_ref[...] = (_C * (y_old + y_new)).astype(o_ref.dtype)


# ------------------------ one-time parameter prep ----------------------------
def prepare_sinres_params(params, *, alpha, use_bf16=False):
    """One-time weight-side transform. Call once and cache; do NOT call per step.

    - folds alpha into the sine-branch weight ((alpha*x)@W == x@(alpha*W)),
    - fuses [alpha*W | Wp] / [b | bp] into one weight/bias with a 128-aligned
      split point when process_x is a Linear,
    - optionally casts the weight to bf16 (bias stays f32: post-accum add).
    """
    in_dim, out_dim = params["w"].shape
    has_process = "wp" in params
    if not has_process:
        assert in_dim == out_dim, "Identity residual requires in_dim == out_dim"
    wdt = jnp.bfloat16 if use_bf16 else jnp.float32

    if has_process:
        out_p = _round_up(out_dim, 128)                 # lane-aligned split point
        w = jnp.zeros((in_dim, 2 * out_p), jnp.float32)
        w = w.at[:, :out_dim].set(alpha * params["w"])          # sine branch
        w = w.at[:, out_p:out_p + out_dim].set(params["wp"])    # residual branch
        b = jnp.zeros((1, 2 * out_p), jnp.float32)
        b = b.at[:, :out_dim].set(params["b"])
        b = b.at[:, out_p:out_p + out_dim].set(params["bp"])
    else:
        out_p = out_dim                                  # no padding needed
        w = (alpha * params["w"]).astype(jnp.float32)
        b = params["b"].astype(jnp.float32)

    return {
        "in_dim": in_dim, "out_dim": out_dim, "out_p": out_p,
        "has_process": has_process,
        "compute_dtype": jnp.bfloat16 if use_bf16 else jnp.float32,
        "w": w.astype(wdt),
        "b": b,
    }


# ------------------------------ wrapper --------------------------------------
def sinres_apply(x, prep, *, tb=1024, out_dtype=jnp.float32):
    N, in_dim = x.shape
    assert in_dim == prep["in_dim"]
    has_process = prep["has_process"]
    out_dim, out_p = prep["out_dim"], prep["out_p"]
    out_cols = out_p if has_process else out_dim
    w, b = prep["w"], prep["b"]
    wcols = w.shape[1]

    x_item = jnp.dtype(x.dtype).itemsize
    o_item = jnp.dtype(out_dtype).itemsize
    # weights/biases are single-buffered (Buffered(1)) -> one resident copy
    w_bytes = int(w.size) * w.dtype.itemsize + int(b.size) * b.dtype.itemsize

    cap = int(0.75 * _vmem_capacity_bytes())

    # Batch tile: large by default, multiple of 8, and with >= 2 grid steps so
    # v7x's two TensorCores both get work on the "parallel" batch axis.
    tb_eff = min(_round_up(tb, 8), _round_up(N, 8))
    if N > 8 and pl.cdiv(N, tb_eff) < 2:
        tb_eff = _round_up(pl.cdiv(N, 2), 8)

    def tiles_bytes(t):  # double-buffered x and output tiles
        return 2 * t * in_dim * x_item + 2 * t * out_cols * o_item

    while tb_eff > 64 and tiles_bytes(tb_eff) + w_bytes > cap - (4 << 20):
        tb_eff = _round_up(tb_eff // 2, 8)

    grid0 = pl.cdiv(N, tb_eff)
    est = tiles_bytes(tb_eff) + w_bytes
    vmem_limit = int(min(cap, max(32 << 20, est + (est >> 2) + (2 << 20))))

    kernel = functools.partial(
        sinres_kernel,
        has_process=has_process,
        split=out_p,
        compute_dtype=prep["compute_dtype"],
    )

    out = pl.pallas_call(
        kernel,
        out_shape=jax.ShapeDtypeStruct((N, out_cols), out_dtype),
        grid_spec=pltpu.PrefetchScalarGridSpec(
            num_scalar_prefetch=0,
            grid=(grid0,),
            in_specs=[
                pl.BlockSpec((tb_eff, in_dim), lambda i: (i, 0)),
                pl.BlockSpec((in_dim, wcols), lambda i: (0, 0),
                             pipeline_mode=pl.Buffered(1)),
                pl.BlockSpec((1, wcols), lambda i: (0, 0),
                             pipeline_mode=pl.Buffered(1)),
            ],
            out_specs=pl.BlockSpec((tb_eff, out_cols), lambda i: (i, 0)),
        ),
        compiler_params=pltpu.CompilerParams(
            dimension_semantics=("parallel",),
            vmem_limit_bytes=vmem_limit,
        ),
    )(x, w, b)

    # Column slice only when the fused/padded output is wider than out_dim.
    return out if out_cols == out_dim else out[:, :out_dim]


def sinres_forward(x, params, *, alpha, tb=1024, use_bf16=False,
                   out_dtype=jnp.float32):
    """Convenience one-shot path. For hot loops, call prepare_sinres_params
    once and reuse sinres_apply."""
    prep = prepare_sinres_params(params, alpha=alpha, use_bf16=use_bf16)
    return sinres_apply(x, prep, tb=tb, out_dtype=out_dtype)


# ----------------- deterministic parameter init (mirrors __init__) -----------
def init_sinres_params(key, in_dim, out_dim, alpha, is_first):
    kw, kb, kpw, kpb = jax.random.split(key, 4)
    if is_first:
        w_bound = 1.0 / in_dim
    else:
        w_bound = float(np.sqrt(6.0 / in_dim)) / alpha
    b_bound = 1.0 / float(np.sqrt(in_dim))  # PyTorch default bias/linear init
    p = {
        "w": jax.random.uniform(kw, (in_dim, out_dim), jnp.float32, -w_bound, w_bound),
        "b": jax.random.uniform(kb, (1, out_dim), jnp.float32, -b_bound, b_bound),
    }
    if out_dim != in_dim:  # process_x = nn.Linear (default init)
        p["wp"] = jax.random.uniform(kpw, (in_dim, out_dim), jnp.float32, -b_bound, b_bound)
        p["bp"] = jax.random.uniform(kpb, (1, out_dim), jnp.float32, -b_bound, b_bound)
    return p


# ----------------- pure-JAX reference for a sanity check ---------------------
def sinres_ref(x, p, *, alpha):
    y_old = x @ p["wp"] + p["bp"] if "wp" in p else x
    y_new = jnp.sin((alpha * x) @ p["w"] + p["b"])
    return _C * (y_old + y_new)


if __name__ == "__main__":
    key = jax.random.PRNGKey(0)
    k1, k2, k3, k4 = jax.random.split(key, 4)

    # ---- Case A: out_dim != in_dim -> process_x is a Linear (fused weight) ----
    in_dim, out_dim, alpha = 32, 64, 3.0
    batch = 19  # exercises the partial last block + the >=2-grid-step split
    xA = jax.random.uniform(k1, (batch, in_dim), jnp.float32, -1.0, 1.0)
    pA = init_sinres_params(k2, in_dim, out_dim, alpha, is_first=False)

    prepA = prepare_sinres_params(pA, alpha=alpha)           # prep once
    yA = jax.block_until_ready(sinres_apply(xA, prepA))       # hot path
    np.testing.assert_allclose(np.asarray(yA),
                               np.asarray(sinres_ref(xA, pA, alpha=alpha)),
                               rtol=1e-4, atol=1e-5)

    # ---- Case B: out_dim == in_dim -> process_x is Identity (f32 residual) ----
    dim, alpha_b = 48, 1.5
    xB = jax.random.uniform(k3, (8, dim), jnp.float32, -1.0, 1.0)
    pB = init_sinres_params(k4, dim, dim, alpha_b, is_first=True)
    prepB = prepare_sinres_params(pB, alpha=alpha_b)
    yB = jax.block_until_ready(sinres_apply(xB, prepB))
    np.testing.assert_allclose(np.asarray(yB),
                               np.asarray(sinres_ref(xB, pB, alpha=alpha_b)),
                               rtol=1e-4, atol=1e-5)

    # ---- Case C: bf16-streamed x + bf16 MXU operands, f32 accumulation ----
    prepC = prepare_sinres_params(pA, alpha=alpha, use_bf16=True)
    xA_bf = xA.astype(jnp.bfloat16)                 # caller supplies bf16 input
    yC = jax.block_until_ready(sinres_apply(xA_bf, prepC))
    np.testing.assert_allclose(
        np.asarray(yC),
        np.asarray(sinres_ref(xA_bf.astype(jnp.float32), pA, alpha=alpha)),
        rtol=2e-2, atol=2e-2)

    print("KERNEL_OK")
</pallas_src>

<mosaic_0001>
module attributes {stable_mosaic.version = 11 : i64} {
  func.func @sinres_kernel(%arg0: i32, %arg1: memref<16x32xf32, #tpu.memory_space<vmem>>, %arg2: memref<32x256xf32, #tpu.memory_space<vmem>>, %arg3: memref<1x256xf32, #tpu.memory_space<vmem>>, %arg4: memref<16x128xf32, #tpu.memory_space<vmem>>) attributes {dimension_semantics = [#tpu.dimension_semantics<parallel>], iteration_bounds = array<i64: 2>, scalar_prefetch = 0 : i64, scratch_operands = 0 : i64, tpu.core_type = #tpu.core_type<tc>, window_params = [{transform_indices = @transform_0, window_bounds = array<i64: 16, 32>}, {pipeline_mode = #tpu.pipeline_mode<synchronous>, transform_indices = @transform_1, window_bounds = array<i64: 32, 256>}, {pipeline_mode = #tpu.pipeline_mode<synchronous>, transform_indices = @transform_2, window_bounds = array<i64: 1, 256>}, {transform_indices = @transform_3, window_bounds = array<i64: 16, 128>}]} {
    %c0 = arith.constant 0 : index
    %c0_0 = arith.constant 0 : index
    %0 = vector.load %arg1[%c0, %c0_0] : memref<16x32xf32, #tpu.memory_space<vmem>>, vector<16x32xf32>
    %c0_1 = arith.constant 0 : index
    %c0_2 = arith.constant 0 : index
    %1 = vector.load %arg2[%c0_1, %c0_2] : memref<32x256xf32, #tpu.memory_space<vmem>>, vector<32x256xf32>
    %cst = arith.constant dense<0.000000e+00> : vector<16x256xf32>
    %2 = tpu.matmul %0, %1, %cst {dimension_numbers = #tpu.dot_dimension_numbers<[1], [0], [0], [1], [0, 0, 1, 1], [], []>} : vector<16x32xf32>, vector<32x256xf32>, vector<16x256xf32> -> vector<16x256xf32>
    %c0_3 = arith.constant 0 : index
    %c0_4 = arith.constant 0 : index
    %3 = vector.load %arg3[%c0_3, %c0_4] : memref<1x256xf32, #tpu.memory_space<vmem>>, vector<1x256xf32>
    %4 = vector.broadcast %3 : vector<1x256xf32> to vector<16x256xf32>
    %5 = arith.addf %2, %4 : vector<16x256xf32>
    %6 = vector.extract_strided_slice %5 {offsets = [0, 0], sizes = [16, 128], strides = [1, 1]} : vector<16x256xf32> to vector<16x128xf32>
    %7 = math.sin %6 : vector<16x128xf32>
    %8 = vector.extract_strided_slice %5 {offsets = [0, 128], sizes = [16, 128], strides = [1, 1]} : vector<16x256xf32> to vector<16x128xf32>
    %9 = arith.addf %8, %7 : vector<16x128xf32>
    %cst_5 = arith.constant 0.707106769 : f32
    %10 = vector.broadcast %cst_5 : f32 to vector<16x128xf32>
    %11 = arith.mulf %10, %9 : vector<16x128xf32>
    %c0_6 = arith.constant 0 : index
    %c0_7 = arith.constant 0 : index
    %12 = vector.load %arg4[%c0_6, %c0_7] : memref<16x128xf32, #tpu.memory_space<vmem>>, vector<16x128xf32>
    tpu.vector_store %arg4[%c0_6, %c0_7], %11 {strides = array<i32>} : memref<16x128xf32, #tpu.memory_space<vmem>>, vector<16x128xf32>,
    return
  }
  func.func @transform_0(%arg0: i32) -> (i32, i32) {
    %c0_i32 = arith.constant 0 : i32
    %c0_i32_0 = arith.constant 0 : i32
    return %arg0, %c0_i32 : i32, i32
  }
  func.func @transform_1(%arg0: i32) -> (i32, i32) {
    %c0_i32 = arith.constant 0 : i32
    %c0_i32_0 = arith.constant 0 : i32
    %c0_i32_1 = arith.constant 0 : i32
    return %c0_i32, %c0_i32_0 : i32, i32
  }
  func.func @transform_2(%arg0: i32) -> (i32, i32) {
    %c0_i32 = arith.constant 0 : i32
    %c0_i32_0 = arith.constant 0 : i32
    %c0_i32_1 = arith.constant 0 : i32
    return %c0_i32, %c0_i32_0 : i32, i32
  }
  func.func @transform_3(%arg0: i32) -> (i32, i32) {
    %c0_i32 = arith.constant 0 : i32
    %c0_i32_0 = arith.constant 0 : i32
    return %arg0, %c0_i32 : i32, i32
  }
}

</mosaic_0001>

<bundles_post_ra>
// kernel: tpu_custom_call.1
= control target key start
LH: loop header
LB: loop body
LE: loop exit
PB: predicated region body
PF: predicated region fallthrough
CT: control target
= control target key end

     0   :  { %8 = vsyncpa [#allocation3], 0  ;;  %s1237_s0 = inlined_call_operand.hbm [shape: f32[19,32], index: 0, kind: input, shape index: {}]   ;;  %s1238_s1 = inlined_call_operand.hbm [shape: f32[32,256], index: 1, kind: input, shape index: {}]   ;;  %s1239_s2 = inlined_call_operand.vmem [shape: f32[1,256], index: 2, kind: input, shape index: {}]   ;;  %s1240_s3 = inlined_call_operand.hbm [shape: f32[19,128], index: 3, kind: output, shape index: {}]  }
   0x1   :  { %10 = vsyncpa [#allocation3 + $0x1], 0 }
   0x2   :  { %11 = vsyncpa [#allocation6], 0 }
   0x3   :  { %12 = vsyncpa [#allocation4], 0 }
   0x4   :  { %14 = vsyncpa [#allocation4 + $0x1], 0  ;;  %s934_s12 = smov 0   ;;  %s936_s13 = smov 0  }
   0x5   :  { %s938_s14 = smov 0   ;;  %s940_s15 = smov 0  }
   0x6 LB: > { %s955_s16 = sadd.s32 4294967295, %s896_s15   ;;  %s643_s17 = sadd.s32 4294967294, %s896_s15   ;;  %s896_s15 = sphi %s940_s15, %s1262_s15   ;;  %s892_s14 = sphi %s938_s14, %s1261_s14   ;;  %s888_s13 = sphi %s936_s13, %s1260_s13   ;;  %s884_s12 = sphi %s934_s12, %s1259_s12  }
   0x7   : > { %s959_s18 = sadd.s32 1, %s896_s15   ;;  %s27_s19 = sadd.s32 1, %s892_s14 }
   0x8   : > { %s24_s20 = ssub.s32 %s896_s15, %s959_s18  ;;  %p34_p0 = scmp.ne.s32.totalorder %s892_s14, %s888_s13 }
   0x9   : > { %p25_p1 = scmp.eq.s32.totalorder %s24_s20, 0  ;;  %p35_p2 = scmp.eq.s32.totalorder %s896_s15, 0 }
   0xa   : > { %p40_p3 = scmp.ne.s32.totalorder %s888_s13, %s884_s12  ;;  %p1241_p4 = scmp.eq.s32.totalorder %s955_s16, 0 }
   0xb   : > { %s971_s21 = scalar_select %p25_p1, %s892_s14, %s27_s19  }
   0xc   : > { %p973_p5 = por %p35_p2, %p34_p0  ;;  %p979_p6 = por %p1241_p4, %p40_p3 }
   0xd   : > { %p106_p7 = scmp.eq.s32.totalorder %s955_s16, 1  ;;  %p112_p8 = scmp.eq.s32.totalorder %s643_s17, 1 }
   0xe   : > { %s1244_s22 = scalar_select %p973_p5, 1, 0 }
   0xf   : > { %s1245_s23 = scalar_select %p979_p6, 1, 0 }
  0x10   : > { %p644_p9 = scmp.ge.s32.totalorder %s896_s15, 1  ;;  %p119_p10 = scmp.lt.s32.totalorder %s896_s15, 3 }
  0x11   : > { %p986_p11 = por %p106_p7, %p34_p0  ;;  %p990_p12 = por %p112_p8, %p40_p3 }
  0x12   : > { %p994_p13 = pnand %p644_p9, %p119_p10  ;;  %s898_s27 = smov [#allocation5]  }
  0x13   : > { %s1246_s24 = scalar_select %p986_p11, 1, 0 }
  0x14   : > { %s1247_s25 = scalar_select %p990_p12, 1, 0 }
  0x15   : > { %s1248_s26 = scalar_select %p994_p13, 1, 0 }
  0x16   : > { %p705_p1 = pneg %p994_p13  ;;  %s131_s28 = sshll.u32 %s898_s27, 4  ;;  %s132_s28 = int_to_ptr.vmem [resolvable:$true] %s131_s28 }
  0x17   : > { %s770_s5 = scalar_lea.hbm %s1238_s1, 1024 }
  0x18   : > { %p1002_p2 = pnand %p705_p1, %p1241_p4  ;;  %p771_p0 = scmp.ne.s32.totalorder %s1238_s1, %s770_s5 }
  0x19   : > { %p777_p9 = scmp.lt.u32.totalorder %s770_s5, %s1238_s1 }
  0x1a   : > { %p772_p3 = pneg %p1002_p2 }
  0x1c   : > { %p773_p7 = pnand %p772_p3, %p771_p0 }
  0x1e   : > { %p774_p8 = pneg %p773_p7 }
  0x20   : > { %p779_p10 = pnand %p777_p9, %p774_p8 }
  0x22   : > { %782 = shalt.err (!%p779_p10)
}
  0x23   : > { %s783_s10 = scalar_lea.vmem %s132_s28, 1024  ;;  %p791_p11 = scmp.lt.s32.totalorder %s132_s28, %s132_s28 }
  0x24   : > { %p784_p1 = scmp.ne.s32.totalorder %s132_s28, %s783_s10  ;;  %p792_p6 = scmp.lt.s32.totalorder %s783_s10, %s783_s10 }
  0x26   : > { %p786_p4 = pnand %p784_p1, %p772_p3  ;;  %p793_p13 = por %p792_p6, %p791_p11 }
  0x28   : > { %p787_p12 = pneg %p786_p4 }
  0x2a   : > { %p794_p5 = pnand %p793_p13, %p787_p12 }
  0x2c   : > { %797 = shalt.err (!%p794_p5)
}
  0x2d   : > { %s899_s11 = smov 256   ;;  %s900_s17 = smov 16  }
  0x2e   : > { %708 = dma.hbm_to_vmem [thread:$0]  (!%p1002_p2), %s1238_s1, 1024, %s132_s28, [#allocation6], %s899_s11, %s899_s11, %s900_s17  }
  0x2f   : > { %p646_p0 = scmp.ge.s32.totalorder %s896_s15, 2 }
  0x30   : > { %p1250_p4 = scmp.ne.s32.totalorder (!%p646_p0), %s1244_s22, 0 }
  0x31   : > { %144 = sbr.rel (%p646_p0) target bundleno = 91 (0x5b), region = 24 }
  0x38   : > { %147 = sbr.rel (!%p1250_p4) target bundleno = 91 (0x5b), region = 28  ;;  %s148_s27 = sand.u32 (%p1250_p4), 1, %s892_s14  }
  0x39   : > { %s648_s30 = sshll.u32 (%p1250_p4), %s896_s15, 1  ;;  %s647_s4 = sshll.u32 (%p1250_p4), %s148_s27, 4 }
  0x3a   : > { %s154_s5 = ssub.s32 (%p1250_p4), 3, %s648_s30  ;;  %s1032_s6 = scalar_lea.sflag (%p1250_p4), [#allocation3], %s148_s27 }
  0x3b   : > { %p155_p5 = scmp.lt.s32.totalorder (%p1250_p4), %s154_s5, 2  ;;  %s152_s7 = scalar_lea.vmem (%p1250_p4), [#allocation2], %s647_s4 }
  0x3f   : > { %s1264_s5 = smov (!%p155_p5, %s154_s5), 2 }
  0x40   : > { %s1029_s29 = sshll.u32 %s1264_s5, 7 }
  0x41   : > { %s159_s28 = ssub.s32 256, %s1029_s29 }
  0x42   : > { %160 = vsyncadd %s1032_s6, %s159_s28  ;;  %p650_p6 = scmp.ne.s32.totalorder %s1029_s29, 0  ;;  %s677_s22 = sshll.u32 %s896_s15, 8 }
  0x43   : > { %s1040_s10 = scalar_lea.hbm %s1237_s0, %s677_s22  ;;  %s165_s11 = sshll.u32 %s152_s7, 4  ;;  %s1042_s11 = int_to_ptr.vmem [resolvable:$true] %s165_s11 }
  0x44   : > { %s798_s17 = scalar_lea.hbm %s1040_s10, %s1029_s29  ;;  %s802_s27 = scalar_lea.hbm %s1237_s0, 384 }
  0x45   : > { %p799_p11 = scmp.ne.s32.totalorder %s1040_s10, %s798_s17  ;;  %p803_p2 = scmp.lt.u32.totalorder %s1040_s10, %s1237_s0 }
  0x46   : > { %p804_p3 = scmp.lt.u32.totalorder %s802_s27, %s798_s17  ;;  %p806_p8 = scmp.lt.u32.totalorder %s798_s17, %s1040_s10 }
  0x47   : > { %p800_p12 = pnand %p799_p11, %p650_p6 }
  0x48   : > { %p805_p7 = por %p804_p3, %p803_p2 }
  0x49   : > { %p801_p13 = pneg %p800_p12 }
  0x4a   : > { %p807_p9 = por %p806_p8, %p805_p7 }
  0x4c   : > { %p808_p10 = pnand %p807_p9, %p801_p13 }
  0x4e   : > { %811 = shalt.err (!%p808_p10)
}
  0x4f   : > { %s812_s5 = scalar_lea.vmem %s1042_s11, %s1029_s29  ;;  %s901_s28 = smov [#allocation2]  }
  0x50   : > { %p813_p1 = scmp.ne.s32.totalorder %s1042_s11, %s812_s5  ;;  %s816_s7 = sshll.u32 %s901_s28, 4  ;;  %s817_s7 = int_to_ptr.vmem [resolvable:$false] %s816_s7 }
  0x51   : > { %s818_s22 = scalar_lea.vmem %s817_s7, 512  ;;  %p819_p11 = scmp.lt.s32.totalorder %s1042_s11, %s817_s7 }
  0x52   : > { %p814_p4 = pnand %p813_p1, %p650_p6  ;;  %p820_p12 = scmp.lt.s32.totalorder %s818_s22, %s812_s5 }
  0x54   : > { %p815_p5 = pneg %p814_p4  ;;  %p821_p2 = por %p820_p12, %p819_p11 }
  0x56   : > { %p822_p3 = pnand %p821_p2, %p815_p5 }
  0x58   : > { %825 = shalt.err (!%p822_p3)
}
  0x59   : > { %s902_s8 = smov 128   ;;  %s903_s9 = smov 8  }
  0x5a   : > { %171 = dma.hbm_to_vmem [thread:$0]  (%p650_p6), %s1040_s10, %s1029_s29, %s1042_s11, %s1032_s6, %s902_s8, %s902_s8, %s903_s9  }
  0x5b PF: > { %p1251_p13 = scmp.ne.s32.totalorder %s1248_s26, 0 }
  0x5c   : > { %s1072_s17 = sand.u32 (!%p1251_p13), 1, %s888_s13   ;;  %p1252_p7 = scmp.ne.s32.totalorder (!%p1251_p13), %s1245_s23, 0 }
  0x5d   : > { %177 = sbr.rel (%p1251_p13) target bundleno = 451 (0x1c3), region = 32  ;;  %s655_s19 = sshll.u32 (!%p1251_p13), %s1072_s17, 4 }
  0x5e   : > { %s180_s20 = scalar_lea.sflag (!%p1251_p13), [#allocation3], %s1072_s17  ;;  %s183_s27 = scalar_lea.vmem (!%p1251_p13), [#allocation2], %s655_s19 }
  0x64   : > { %871 = dma.done.wait (%p1252_p7), %s180_s20, 256  }
  0x65   : > { %873 = vsyncadd (%p1252_p7), %s180_s20, 4294967040  ;;  %p1253_p6 = scmp.eq.s32.totalorder %s955_s16, 0 }
  0x67   : > { %875 = dma.done.wait (%p1253_p6), [#allocation6], 1024   ;;  %p1254_p8 = pmov %p1253_p6 }
  0x68   : > { %v904_v0 = vmov 0.0   ;;  %v223_v1 = vld [vmem:[#allocation5 + $0x8] sm:$0xff]  ;;  %v225_v2 = vld [vmem:[#allocation5 + $0x18] sm:$0xff]  ;;  %v222_v3 = vld [vmem:[#allocation5] sm:$0xff]  ;;  %vm242_vm0 = vcmask 261120   ;;  %v232_v15 = vlaneseq  ;;  %s209_s29 = scalar_lea.vmem [#allocation7], %s655_s19 }
  0x69   : > { %877 = vsyncadd (%p1254_p8), [#allocation6], 4294966272  ;;  %313 = vmatprep.mubr.f32.mxu0 %v904_v0  ;;  %319 = vmatprep.mubr.f32.mxu1 %v904_v0  ;;  %v679_v4 = vpack.c.bf16 %v225_v2, %v223_v1  ;;  %v224_v5 = vld [vmem:[#allocation5 + $0x10] sm:$0xff]  ;;  %v227_v6 = vld [vmem:[#allocation5 + $0x28] sm:$0xff]  ;;  %v905_v46 = vmov 683565275  }
  0x6a   : > { %v229_v7 = vld [vmem:[#allocation5 + $0x38] sm:$0xff]  ;;  %v681_v8 = vpack.c.bf16 %v224_v5, %v222_v3  ;;  %v226_v10 = vld [vmem:[#allocation5 + $0x20] sm:$0xff]  ;;  %v228_v11 = vld [vmem:[#allocation5 + $0x30] sm:$0xff]  ;;  %v1086_v16 = vshrl.u32 %v232_v15, 7  ;;  %v906_v50 = vmov 2475754826  }
  0x6b   : > { %v683_v9 = vpack.c.bf16 %v229_v7, %v227_v6  ;;  %680 = vmatprep.subr.bf16.mxu0 %v679_v4  ;;  %687 = vmatprep.subr.bf16.mxu1 %v679_v4  ;;  %v685_v12 = vpack.c.bf16 %v228_v11, %v226_v10  ;;  %v220_v13 = vld [vmem:[%s183_s27] sm:$0xff]  ;;  %v221_v14 = vld [vmem:[%s183_s27 + $0x8] sm:$0xff]  ;;  %v907_v52 = vmov 2131351028   ;;  %v908_v54 = vmov 2102212464  }
  0x6c   : > { %682 = vmatpush1.bf16.msra.mxu0 %v681_v8  ;;  %689 = vmatpush1.bf16.msra.mxu1 %v681_v8  ;;  %v234_v17 = vsub.s32 0, %v1086_v16  ;;  %v1092_v18 = vld [vmem:[%s1239_s2] sm:$0x3]  ;;  %v909_v56 = vmov 920167782   ;;  %s541_s6 = scalar_lea.sflag [#allocation4], %s1072_s17 }
  0x6d   : > { %684 = vmatprep.subr.bf16.mxu0 %v683_v9  ;;  %688 = vmatprep.subr.bf16.mxu1 %v683_v9  ;;  %v910_v63 = vmov 1326507024   ;;  %p1257_p9 = scmp.ne.s32.totalorder %s1246_s24, 0 }
  0x6e   : > { %v235_v19 = vrot.slane %v1092_v18, %v234_v17  ;;  %s669_s10 = sshll.u32 (%p1257_p9), %s955_s16, 1 }
  0x6f   : > { %s549_s11 = ssub.s32 (%p1257_p9), 3, %s669_s10 }
  0x70   : > { %686 = vmatpush1.bf16.msra.mxu0 %v685_v12  ;;  %690 = vmatpush1.bf16.msra.mxu1 %v685_v12  ;;  %p550_p10 = scmp.lt.s32.totalorder (%p1257_p9), %s549_s11, 2 }
  0x73   : > { %658 = vmatmul.mubr.msk.f32.vlgmr.msra.gmra.mrb[0].mxu0 %vm242_vm0, %v220_v13  ;;  %659 = vmatmul.mubr.msk.f32.vlgmr.msra.gmra.mrb[0].mxu1 %vm242_vm0, %v221_v14 }
 0x146   : > { %v315_v20 = vpop.f32.mrb[0].mxu0  ;;  %v321_v21 = vpop.f32.mrb[0].mxu1 }
 0x147   : > { %v1095_v22 = vadd.f32 %v315_v20, %v235_v19  ;;  %v1097_v23 = vadd.f32 %v321_v21, %v235_v19  ;;  %v1099_v24 = vpop.f32.mrb[1].mxu0  ;;  %v1101_v25 = vpop.f32.mrb[1].mxu1 }
 0x149   : > { %v326_v26 = vand.u32 2147483647, %v1095_v22  ;;  %v329_v27 = vand.u32 2139095040, %v1095_v22  ;;  %v433_v28 = vand.u32 2139095040, %v1097_v23  ;;  %v430_v31 = vand.u32 2147483647, %v1097_v23 }
 0x14a   : > { %vm328_vm15 = vcmp.lt.s32.totalorder %v1095_v22, 0 }
 0x14b   : > { %v330_v29 = vshrl.u32 %v329_v27, 23  ;;  %v333_v30 = vand.u32 8388607, %v326_v26  ;;  %v434_v32 = vshrl.u32 %v433_v28, 23  ;;  %v1111_v37 = vand.u32 8388607, %v430_v31 }
 0x14c   : > { %vm327_vm0 = vcmp.le.f32.partialorder %v326_v26, 0.7853982 }
 0x14d   : > { %v660_v33 = vadd.s32 4294967169, %v330_v29  ;;  %v664_v34 = vadd.s32 4294967169, %v434_v32  ;;  %v334_v36 = vor.u32 8388608, %v333_v30  ;;  %v438_v44 = vor.u32 8388608, %v1111_v37 }
 0x14f   : > { %v336_v35 = vadd.s32 1, %v660_v33  ;;  %v440_v38 = vadd.s32 1, %v664_v34  ;;  %v1113_v43 = vshll.u32 %v334_v36, 8 }
 0x151   : > { %vm337_vm1 = vcmp.gt.s32.totalorder %v336_v35, 0  ;;  %vm441_vm2 = vcmp.gt.s32.totalorder %v440_v38, 0 }
 0x152   : > { %v338_v39 = vsel %vm337_vm1, %v336_v35, 0  ;;  %v442_v42 = vsel %vm441_vm2, %v440_v38, 0  ;;  %vm432_vm1 = vcmp.lt.s32.totalorder %v1097_v23, 0  ;;  %vm1158_vm2 = vcmp.le.f32.partialorder %v430_v31, 0.7853982 }
 0x153   : > { %v339_v40 = vshrl.u32 %v338_v39, 5  ;;  %v340_v41 = vand.u32 31, %v338_v39  ;;  %v1116_v48 = vshrl.u32 %v442_v42, 5  ;;  %v444_v49 = vand.u32 31, %v442_v42 }
 0x155   : > { %v341_v45 = vsub.s32 32, %v340_v41  ;;  %v343_v47 = vshll.u32 %v905_v46, %v340_v41  ;;  %v346_v51 = vshll.u32 %v906_v50, %v340_v41  ;;  %v349_v53 = vshll.u32 %v907_v52, %v340_v41 }
 0x156   : > { %v352_v55 = vshll.u32 %v908_v54, %v340_v41  ;;  %v355_v57 = vshll.u32 %v909_v56, %v340_v41  ;;  %vm358_vm3 = vcmp.lt.s32.totalorder %v339_v40, 1  ;;  %vm359_vm4 = vcmp.lt.s32.totalorder %v339_v40, 2 }
 0x157   : > { %v344_v58 = vshrl.u32 %v906_v50, %v341_v45  ;;  %v347_v59 = vshrl.u32 %v907_v52, %v341_v45  ;;  %v350_v60 = vshrl.u32 %v908_v54, %v341_v45  ;;  %v342_v61 = vshrl.u32 %v905_v46, %v341_v45 }
 0x158   : > { %v353_v62 = vshrl.u32 %v909_v56, %v341_v45  ;;  %v356_v0 = vshrl.u32 %v910_v63, %v341_v45  ;;  %v445_v4 = vsub.s32 32, %v444_v49  ;;  %vm360_vm5 = vcmp.lt.s32.totalorder %v339_v40, 3 }
 0x159   : > { %v345_v1 = vor.u32 %v344_v58, %v343_v47  ;;  %v348_v2 = vor.u32 %v347_v59, %v346_v51  ;;  %v351_v3 = vor.u32 %v350_v60, %v349_v53  ;;  %vm361_vm6 = vcmp.lt.s32.totalorder %v339_v40, 4 }
 0x15a   : > { %v354_v5 = vor.u32 %v353_v62, %v352_v55  ;;  %v357_v6 = vor.u32 %v356_v0, %v355_v57  ;;  %v447_v14 = vshll.u32 %v905_v46, %v444_v49  ;;  %v448_v19 = vshrl.u32 %v906_v50, %v445_v4 }
 0x15b   : > { %v362_v7 = vsel %vm358_vm3, %v342_v61, %v345_v1  ;;  %v363_v8 = vsel %vm361_vm6, %v351_v3, 2102212464  ;;  %v366_v9 = vsel %vm358_vm3, %v345_v1, %v348_v2  ;;  %v370_v10 = vsel %vm358_vm3, %v348_v2, %v351_v3 }
 0x15c   : > { %v364_v11 = vsel %vm360_vm5, %v348_v2, %v363_v8  ;;  %v367_v12 = vsel %vm361_vm6, %v354_v5, 920167782  ;;  %v371_v13 = vsel %vm361_vm6, %v357_v6, 1326507024  ;;  %v450_v20 = vshll.u32 %v906_v50, %v444_v49 }
 0x15d   : > { %v368_v15 = vsel %vm360_vm5, %v351_v3, %v367_v12  ;;  %v372_v17 = vsel %vm360_vm5, %v354_v5, %v371_v13  ;;  %v365_v21 = vsel %vm359_vm4, %v362_v7, %v364_v11  ;;  %v451_v29 = vshrl.u32 %v907_v52, %v445_v4 }
 0x15e   : > { %v369_v27 = vsel %vm359_vm4, %v366_v9, %v368_v15  ;;  %v373_v28 = vsel %vm359_vm4, %v370_v10, %v372_v17  ;;  %v449_v35 = vor.u32 %v448_v19, %v447_v14  ;;  %v453_v37 = vshll.u32 %v907_v52, %v444_v49 }
 0x15f   : > { %v1125_v30 = vmul.u32.u64.low %v1113_v43, %v373_v28  ;;  %v1126_v32 = vmul.u32.u64.high %v1113_v43, %v373_v28, %v1125_v30  ;;  %v1129_v33 = vmul.u32.u64.low %v1113_v43, %v369_v27  ;;  %v1130_v34 = vmul.u32.u64.high %v1113_v43, %v369_v27, %v1129_v33 }
 0x160   : > { %v452_v36 = vor.u32 %v451_v29, %v450_v20  ;;  %v454_v38 = vshrl.u32 %v908_v54, %v445_v4  ;;  %v456_v39 = vshll.u32 %v908_v54, %v444_v49  ;;  %v457_v41 = vshrl.u32 %v909_v56, %v445_v4 }
 0x161   : > { %v460_v42 = vshrl.u32 %v910_v63, %v445_v4  ;;  %v478_v45 = vshll.u32 %v438_v44, 8  ;;  %v381_v40 = vmul.u32 %v1113_v43, %v365_v21  ;;  %v446_v47 = vshrl.u32 %v905_v46, %v445_v4 }
 0x162   : > { %v455_v50 = vor.u32 %v454_v38, %v453_v37  ;;  %v459_v51 = vshll.u32 %v909_v56, %v444_v49  ;;  %vm383_vm7 = vc.u32 %v1126_v32, %v1129_v33  ;;  %v384_v53 = vadd.s32 1, %v1130_v34 }
 0x163   : > { %v458_v55 = vor.u32 %v457_v41, %v456_v39  ;;  %vm462_vm8 = vcmp.lt.s32.totalorder %v1116_v48, 1  ;;  %vm464_vm9 = vcmp.lt.s32.totalorder %v1116_v48, 3  ;;  %vm465_vm10 = vcmp.lt.s32.totalorder %v1116_v48, 4 }
 0x164   : > { %v461_v57 = vor.u32 %v460_v42, %v459_v51  ;;  %v470_v52 = vsel %vm462_vm8, %v449_v35, %v452_v36  ;;  %v385_v44 = vsel %vm383_vm7, %v384_v53, %v1130_v34  ;;  %v467_v54 = vsel %vm465_vm10, %v455_v50, 2102212464 }
 0x165   : > { %v471_v43 = vsel %vm465_vm10, %v458_v55, 920167782  ;;  %v474_v46 = vsel %vm462_vm8, %v452_v36, %v455_v50  ;;  %v386_v58 = vadd.s32 %v385_v44, %v381_v40  ;;  %vm463_vm11 = vcmp.lt.s32.totalorder %v1116_v48, 2 }
 0x166   : > { %v472_v49 = vsel %vm464_vm9, %v455_v50, %v471_v43  ;;  %v475_v56 = vsel %vm465_vm10, %v461_v57, 1326507024  ;;  %v466_v59 = vsel %vm462_vm8, %v446_v47, %v449_v35  ;;  %v468_v60 = vsel %vm464_vm9, %v452_v36, %v467_v54 }
 0x167   : > { %v473_v61 = vsel %vm463_vm11, %v470_v52, %v472_v49  ;;  %v476_v62 = vsel %vm464_vm9, %v458_v55, %v475_v56  ;;  %v387_v63 = vadd.s32 536870912, %v386_v58  ;;  %v469_v6 = vsel %vm463_vm11, %v466_v59, %v468_v60 }
 0x168   : > { %v477_v0 = vsel %vm463_vm11, %v474_v46, %v476_v62  ;;  %v1140_v1 = vmul.u32.u64.low %v478_v45, %v473_v61  ;;  %v1141_v2 = vmul.u32.u64.high %v478_v45, %v473_v61, %v1140_v1  ;;  %v485_v48 = vmul.u32 %v478_v45, %v469_v6 }
 0x169   : > { %v1143_v3 = vmul.u32.u64.low %v478_v45, %v477_v0  ;;  %v1144_v4 = vmul.u32.u64.high %v478_v45, %v477_v0, %v1143_v3  ;;  %v388_v5 = vshrl.u32 %v387_v63, 30  ;;  %v382_v29 = vadd.s32 %v1129_v33, %v1126_v32 }
 0x16a   : > { %v488_v8 = vadd.s32 1, %v1141_v2  ;;  %vm418_vm6 = vweird.f32 %v1095_v22  ;;  %vm522_vm10 = vweird.f32 %v1097_v23 }
 0x16b   : > { %v389_v7 = vshll.u32 %v388_v5, 30  ;;  %vm487_vm12 = vc.u32 %v1144_v4, %v1140_v1  ;;  %v486_v53 = vadd.s32 %v1140_v1, %v1144_v4  ;;  %v412_v33 = vsub.s32 4, %v388_v5 }
 0x16c   : > { %v489_v10 = vsel %vm487_vm12, %v488_v8, %v1141_v2 }
 0x16d   : > { %v390_v9 = vsub.s32 %v386_v58, %v389_v7  ;;  %v490_v11 = vadd.s32 %v489_v10, %v485_v48  ;;  %v413_v56 = vsel %vm328_vm15, %v412_v33, %v388_v5  ;;  %v238_v5 = vsub.s32 1, %v1086_v16 }
 0x16e   : > { %v415_v63 = vsel %vm327_vm0, 0, %v413_v56 }
 0x16f   : > { %v392_v12 = vsub.s32 0, %v390_v9  ;;  %v491_v13 = vadd.s32 536870912, %v490_v11  ;;  %v419_v2 = vadd.s32 3, %v415_v63  ;;  %v239_v31 = vrot.slane %v1092_v18, %v238_v5 }
 0x171   : > { %v661_v14 = vmin.u32 %v392_v12, %v390_v9  ;;  %v492_v15 = vshrl.u32 %v491_v13, 30  ;;  %v420_v8 = vand.u32 3, %v419_v2 }
 0x173   : > { %v394_v17 = vclz %v661_v14  ;;  %v493_v19 = vshll.u32 %v492_v15, 30  ;;  %v516_v1 = vsub.s32 4, %v492_v15  ;;  %vm425_vm3 = vcmp.eq.s32.totalorder %v420_v8, 2 }
 0x174   : > { %vm422_vm4 = vcmp.eq.s32.totalorder %v420_v8, 0  ;;  %vm421_vm5 = vcmp.lt.s32.totalorder %v420_v8, 2 }
 0x175   : > { %v662_v20 = vadd.s32 4294967294, %v394_v17  ;;  %v494_v21 = vsub.s32 %v490_v11, %v493_v19  ;;  %v517_v6 = vsel %vm432_vm1, %v516_v1, %v492_v15  ;;  %v318_v15 = vadd.f32 %v1099_v24, %v239_v31 }
 0x177   : > { %vm663_vm13 = vcmp.lt.s32.totalorder %v662_v20, 0  ;;  %v496_v28 = vsub.s32 0, %v494_v21 }
 0x178   : > { %v397_v27 = vsel %vm663_vm13, 0, %v662_v20 }
 0x179   : > { %v398_v30 = vsub.s32 32, %v397_v27  ;;  %v402_v34 = vsub.s32 4294967266, %v397_v27  ;;  %v665_v35 = vmin.u32 %v496_v28, %v494_v21  ;;  %v399_v36 = vshll.u32 %v390_v9, %v397_v27 }
 0x17a   : > { %v519_v9 = vsel %vm1158_vm2, 0, %v517_v6 }
 0x17b   : > { %v400_v37 = vshrl.u32 %v382_v29, %v398_v30  ;;  %v403_v38 = vadd.s32 127, %v402_v34  ;;  %v498_v39 = vclz %v665_v35  ;;  %v523_v13 = vadd.s32 3, %v519_v9 }
 0x17d   : > { %v401_v41 = vor.u32 %v400_v37, %v399_v36  ;;  %v404_v42 = vshll.u32 %v403_v38, 23  ;;  %v666_v45 = vadd.s32 4294967294, %v498_v39 }
 0x17f   : > { %v405_v40 = vor.u32 4788187, %v404_v42  ;;  %vm667_vm14 = vcmp.lt.s32.totalorder %v666_v45, 0  ;;  %v408_v50 = vcvt.s32.f32 %v401_v41 }
 0x180   : > { %v501_v51 = vsel %vm667_vm14, 0, %v666_v45 }
 0x181   : > { %v406_v47 = vand.u32 2147483647, %v405_v40  ;;  %v502_v55 = vsub.s32 32, %v501_v51  ;;  %v506_v57 = vsub.s32 4294967266, %v501_v51  ;;  %v503_v52 = vshll.u32 %v494_v21, %v501_v51 }
 0x182   : > { %v524_v21 = vand.u32 3, %v523_v13 }
 0x183   : > { %v409_v32 = vmul.f32 %v408_v50, %v406_v47  ;;  %v504_v44 = vshrl.u32 %v486_v53, %v502_v55  ;;  %v507_v54 = vadd.s32 127, %v506_v57 }
 0x184   : > { %vm529_vm7 = vcmp.eq.s32.totalorder %v524_v21, 2  ;;  %vm526_vm8 = vcmp.eq.s32.totalorder %v524_v21, 0  ;;  %vm525_vm9 = vcmp.lt.s32.totalorder %v524_v21, 2 }
 0x185   : > { %v410_v43 = vxor.u32 2147483648, %v409_v32  ;;  %v505_v46 = vor.u32 %v504_v44, %v503_v52  ;;  %v508_v58 = vshll.u32 %v507_v54, 23 }
 0x187   : > { %v411_v49 = vsel %vm328_vm15, %v410_v43, %v409_v32  ;;  %v509_v60 = vor.u32 4788187, %v508_v58  ;;  %v512_v62 = vcvt.s32.f32 %v505_v46 }
 0x188   : > { %v414_v59 = vsel %vm327_vm0, %v1095_v22, %v411_v49  ;;  %v324_v22 = vadd.f32 %v1101_v25, %v239_v31 }
 0x189   : > { %762 = vcosq.f32 %v414_v59  ;;  %v510_v61 = vand.u32 2147483647, %v509_v60 }
 0x18a   : > { %764 = vsinq.f32 %v414_v59 }
 0x18b   : > { %v513_v0 = vmul.f32 %v512_v62, %v510_v61 }
 0x18d   : > { %v514_v3 = vxor.u32 2147483648, %v513_v0 }
 0x18f   : > { %v515_v4 = vsel %vm432_vm1, %v514_v3, %v513_v0 }
 0x190   : > { %v518_v7 = vsel %vm1158_vm2, %v1097_v23, %v515_v4 }
 0x191   : > { %766 = vcosq.f32 %v518_v7 }
 0x192   : > { %768 = vsinq.f32 %v518_v7 }
 0x193   : > { %v763_v48 = vpop.eup %762 }
 0x194   : > { %v765_v10 = vpop.eup %764  ;;  %v426_v11 = vxor.u32 2147483648, %v763_v48 }
 0x195   : > { %v423_v12 = vxor.u32 2147483648, %v765_v10 }
 0x196   : > { %v427_v16 = vsel %vm425_vm3, %v426_v11, %v765_v10 }
 0x197   : > { %v424_v14 = vsel %vm422_vm4, %v763_v48, %v423_v12 }
 0x198   : > { %v428_v17 = vsel %vm421_vm5, %v424_v14, %v427_v16 }
 0x199   : > { %v429_v19 = vsel %vm418_vm6, nan, %v428_v17 }
 0x19a   : > { %v534_v20 = vadd.f32 %v429_v19, %v318_v15 }
 0x19b   : > { %v767_v27 = vpop.eup %766 }
 0x19c   : > { %v536_v28 = vmul.f32 0.70710677, %v534_v20  ;;  %v769_v18 = vpop.eup %768  ;;  %v530_v29 = vxor.u32 2147483648, %v767_v27 }
 0x19d   : > { %v527_v30 = vxor.u32 2147483648, %v769_v18 }
 0x19e   : > { %538 = vst [vmem:[%s209_s29] sm:$0xff] %v536_v28  ;;  %v531_v34 = vsel %vm529_vm7, %v530_v29, %v769_v18 }
 0x19f   : > { %v528_v24 = vsel %vm526_vm8, %v767_v27, %v527_v30 }
 0x1a0   : > { %v532_v35 = vsel %vm525_vm9, %v528_v24, %v531_v34  ;;  %547 = sbr.rel (!%p1257_p9) target bundleno = 451 (0x1c3), region = 44 }
 0x1a1   : > { %v533_v36 = vsel %vm522_vm10, nan, %v532_v35 }
 0x1a2   : > { %v535_v37 = vadd.f32 %v533_v36, %v324_v22 }
 0x1a4   : > { %v537_v38 = vmul.f32 0.70710677, %v535_v37 }
 0x1a6   : > { %539 = vst [vmem:[%s209_s29 + $0x8] sm:$0xff] %v537_v38 }
 0x1a7   : > { %s1266_s11 = smov (!%p550_p10, %s549_s11), 2 }
 0x1a8   : > { %s1179_s30 = sshll.u32 %s1266_s11, 7 }
 0x1a9   : > { %s554_s4 = ssub.s32 256, %s1179_s30 }
 0x1aa   : > { %555 = vsyncadd %s541_s6, %s554_s4  ;;  %p671_p1 = scmp.ne.s32.totalorder %s1179_s30, 0  ;;  %s678_s5 = sshll.u32 %s955_s16, 8 }
 0x1ab   : > { %s1189_s7 = scalar_lea.hbm %s1240_s3, %s678_s5  ;;  %s560_s22 = sshll.u32 %s209_s29, 4  ;;  %s1191_s22 = int_to_ptr.vmem [resolvable:$true] %s560_s22 }
 0x1ac   : > { %s826_s8 = scalar_lea.vmem %s1191_s22, %s1179_s30  ;;  %s911_s9 = smov [#allocation7]  }
 0x1ad   : > { %p827_p4 = scmp.ne.s32.totalorder %s1191_s22, %s826_s8  ;;  %s830_s19 = sshll.u32 %s911_s9, 4  ;;  %s831_s19 = int_to_ptr.vmem [resolvable:$false] %s830_s19 }
 0x1ae   : > { %s832_s16 = scalar_lea.vmem %s831_s19, 512  ;;  %p833_p12 = scmp.lt.s32.totalorder %s1191_s22, %s831_s19 }
 0x1af   : > { %p828_p5 = pnand %p827_p4, %p671_p1  ;;  %p834_p2 = scmp.lt.s32.totalorder %s832_s16, %s826_s8 }
 0x1b1   : > { %p829_p11 = pneg %p828_p5  ;;  %p835_p3 = por %p834_p2, %p833_p12 }
 0x1b3   : > { %p836_p13 = pnand %p835_p3, %p829_p11 }
 0x1b5   : > { %839 = shalt.err (!%p836_p13)
}
 0x1b6   : > { %s840_s20 = scalar_lea.hbm %s1189_s7, %s1179_s30  ;;  %s844_s26 = scalar_lea.hbm %s1240_s3, 384 }
 0x1b7   : > { %p841_p7 = scmp.ne.s32.totalorder %s1189_s7, %s840_s20  ;;  %p845_p9 = scmp.lt.u32.totalorder %s1189_s7, %s1240_s3 }
 0x1b8   : > { %p846_p10 = scmp.lt.u32.totalorder %s844_s26, %s840_s20  ;;  %p848_p5 = scmp.lt.u32.totalorder %s840_s20, %s1189_s7 }
 0x1b9   : > { %p842_p6 = pnand %p841_p7, %p671_p1 }
 0x1ba   : > { %p847_p4 = por %p846_p10, %p845_p9 }
 0x1bb   : > { %p843_p8 = pneg %p842_p6 }
 0x1bc   : > { %p849_p11 = por %p848_p5, %p847_p4 }
 0x1be   : > { %p850_p12 = pnand %p849_p11, %p843_p8 }
 0x1c0   : > { %853 = shalt.err (!%p850_p12)
}
 0x1c1   : > { %s912_s11 = smov 128   ;;  %s913_s4 = smov 8  }
 0x1c2   : > { %566 = dma.vmem_to_hbm [thread:$0]  (%p671_p1), %s1191_s22, %s1179_s30, %s1189_s7, %s541_s6, %s912_s11, %s912_s11, %s913_s4  }
 0x1c3 PF: > { %s575_s5 = sand.u32 1, %s884_s12   ;;  %p1258_p2 = scmp.ne.s32.totalorder %s1247_s25, 0 }
 0x1c4   : > { %s576_s24 = scalar_lea.sflag [#allocation4], %s575_s5 }
 0x1c5   : > { %p710_p3 = pnand %p646_p0, %p1258_p2 }
 0x1c7   : > { %879 = dma.done.wait (!%p710_p3), %s576_s24, 256  }
 0x1c8   : > { %881 = vsyncadd (!%p710_p3), %s576_s24, 4294967040  ;;  %p17_p13 = scmp.ge.s32.totalorder %s959_s18, 4   ;;  %s1259_s12 = smov %s888_s13 }
 0x1c9   : > { %s1260_s13 = smov %s892_s14  ;;  %s1261_s14 = smov %s971_s21 }
 0x1ca   : > { %s1262_s15 = smov %s959_s18  ;;  %19 = sbr.rel (!%p17_p13) target bundleno = 6 (0x6), region = 81 }
 0x1d1   :  { %581 = vsyncpa [#allocation3], 1 }
 0x1d2   :  { %583 = vsyncpa [#allocation3 + $0x1], 1 }
 0x1d3   :  { %584 = vsyncpa [#allocation6], 1 }
 0x1d4   :  { %585 = vsyncpa [#allocation4], 1 }
 0x1d5   :  { %587 = vsyncpa [#allocation4 + $0x1], 1 }

</bundles_post_ra>
